<compile_context>
chip_gen: v7x
topology: tpu7x:2x2x1
jax: 0.10.0
libtpu: 0.0.40
codegen_flags: <defaults>
</compile_context>

<pallas_src>
import functools

import jax
import jax.numpy as jnp
from jax.experimental import pallas as pl
from jax.experimental.pallas import tpu as pltpu


def _round_up(n, m):
    return ((n + m - 1) // m) * m


# ----------------------------------------------------------------------------
# Fused kernel: one row-block of the (flattened) batch per program.
#   x_ref   : (ROWS, Hp)  input histograms (zero-padded columns H..Hp)
#   w1t_ref : (Hp, E)     zip weight, pre-transposed + zero-padded rows
#   b1_ref  : (1, E)      zip bias
#   w2t_ref : (E, Hp)     unzip weight, pre-transposed + zero-padded columns
#   b2_ref  : (1, Hp)     unzip bias, zero-padded
#   o_ref   : (ROWS, Hp)  decoded output (padded columns are exactly 0)
# ----------------------------------------------------------------------------
def _zipper_kernel(x_ref, w1t_ref, b1_ref, w2t_ref, b2_ref, o_ref):
    # encode: Linear + ReLU (f32 accumulation on the MXU)
    h = jnp.dot(x_ref[...], w1t_ref[...], preferred_element_type=jnp.float32)
    h = jnp.maximum(h + b1_ref[...], 0.0)
    # decode: Linear
    y = jnp.dot(h.astype(w2t_ref.dtype), w2t_ref[...],
                preferred_element_type=jnp.float32)
    o_ref[...] = (y + b2_ref[...]).astype(o_ref.dtype)


# ----------------------------------------------------------------------------
# One-time parameter preparation (hoisted out of the per-forward path):
# transpose, reshape and zero-pad H -> Hp (next multiple of 128).
# ----------------------------------------------------------------------------
def prepare_zipper_params(w_zip, b_zip, w_unzip, b_unzip, *, lane=128):
    """w_zip: (E, H), b_zip: (E,), w_unzip: (H, E), b_unzip: (H,)."""
    w_zip = jnp.asarray(w_zip)
    b_zip = jnp.asarray(b_zip)
    w_unzip = jnp.asarray(w_unzip)
    b_unzip = jnp.asarray(b_unzip)

    E, H = w_zip.shape
    Hp = _round_up(H, lane)
    dt = w_zip.dtype

    w1t = jnp.zeros((Hp, E), dt).at[:H, :].set(w_zip.T)      # (Hp, E)
    b1 = b_zip.reshape(1, E)                                  # (1, E)
    w2t = jnp.zeros((E, Hp), dt).at[:, :H].set(w_unzip.T)    # (E, Hp)
    b2 = jnp.zeros((1, Hp), dt).at[0, :H].set(b_unzip)       # (1, Hp)
    return w1t, b1, w2t, b2


# ----------------------------------------------------------------------------
# Forward wrapper.  Expects *prepared* params from prepare_zipper_params.
# ----------------------------------------------------------------------------
@functools.partial(jax.jit, static_argnames=("row_tile",))
def transients_zipper_forward(x, w1t, b1, w2t, b2, *, row_tile=256):
    orig_shape = x.shape
    H = orig_shape[-1]
    Hp, E = w1t.shape

    x2d = x.reshape(-1, H)
    M = x2d.shape[0]

    # Row block: MXU-filling (<=256) for large batches, collapsed to a single
    # grid step (M rounded up to a sublane multiple of 8) for tiny batches.
    rows = min(row_tile, _round_up(M, 8))
    M_pad = _round_up(M, rows)
    grid = (M_pad // rows,)

    # Zero-pad rows (tail of a non-divisible M) and columns (H -> Hp).
    # Padded x columns x padded W_zip^T rows = exact K contraction; padded
    # output rows/columns are sliced off below.
    x_in = jnp.zeros((M_pad, Hp), x2d.dtype).at[:M, :H].set(x2d)

    out = pl.pallas_call(
        _zipper_kernel,
        out_shape=jax.ShapeDtypeStruct((M_pad, Hp), x.dtype),
        grid=grid,
        in_specs=[
            pl.BlockSpec((rows, Hp), lambda i: (i, 0)),   # x row-block
            pl.BlockSpec((Hp, E), lambda i: (0, 0)),      # W_zip^T   (resident)
            pl.BlockSpec((1, E), lambda i: (0, 0)),       # b_zip
            pl.BlockSpec((E, Hp), lambda i: (0, 0)),      # W_unzip^T (resident)
            pl.BlockSpec((1, Hp), lambda i: (0, 0)),      # b_unzip
        ],
        out_specs=pl.BlockSpec((rows, Hp), lambda i: (i, 0)),
        compiler_params=pltpu.CompilerParams(
            dimension_semantics=("parallel",)),           # megacore on v7x
    )(x_in, w1t, b1, w2t, b2)

    return out[:M, :H].reshape(orig_shape)


# ----------------------------------------------------------------------------
# Pure-JAX reference for a correctness check.
# ----------------------------------------------------------------------------
def _reference(x, w_zip, b_zip, w_unzip, b_unzip):
    h = jnp.maximum(x @ w_zip.T + b_zip, 0.0)
    return h @ w_unzip.T + b_unzip


if __name__ == "__main__":
    # Module defaults: histogram_length=300, embed_dim=128.  Small batch.
    B, N = 2, 8            # 16 histogram rows total
    HIST, EMB = 300, 128

    key = jax.random.PRNGKey(0)
    kx, kw1, kb1, kw2, kb2 = jax.random.split(key, 5)

    x = jax.random.normal(kx, (B, N, HIST), dtype=jnp.float32)
    # Deterministic parameter init (shapes match nn.Linear in __init__).
    w_zip = jax.random.normal(kw1, (EMB, HIST), dtype=jnp.float32) * (HIST ** -0.5)
    b_zip = jax.random.normal(kb1, (EMB,), dtype=jnp.float32) * 0.01
    w_unzip = jax.random.normal(kw2, (HIST, EMB), dtype=jnp.float32) * (EMB ** -0.5)
    b_unzip = jax.random.normal(kb2, (HIST,), dtype=jnp.float32) * 0.01

    # One-time parameter prep (transpose + pad), hoisted out of the forward.
    params = prepare_zipper_params(w_zip, b_zip, w_unzip, b_unzip)

    out = transients_zipper_forward(x, *params)
    out = jax.block_until_ready(out)

    ref = _reference(x, w_zip, b_zip, w_unzip, b_unzip)
    assert out.shape == (B, N, HIST)
    assert jnp.max(jnp.abs(out - ref)) < 1e-3, "mismatch vs reference"

    print("KERNEL_OK")
</pallas_src>

<mosaic_0001>
module attributes {stable_mosaic.version = 11 : i64} {
  func.func @_zipper_kernel(%arg0: i32, %arg1: memref<16x384xf32, #tpu.memory_space<vmem>>, %arg2: memref<384x128xf32, #tpu.memory_space<vmem>>, %arg3: memref<1x128xf32, #tpu.memory_space<vmem>>, %arg4: memref<128x384xf32, #tpu.memory_space<vmem>>, %arg5: memref<1x384xf32, #tpu.memory_space<vmem>>, %arg6: memref<16x384xf32, #tpu.memory_space<vmem>>) attributes {dimension_semantics = [#tpu.dimension_semantics<parallel>], iteration_bounds = array<i64: 1>, scalar_prefetch = 0 : i64, scratch_operands = 0 : i64, tpu.core_type = #tpu.core_type<tc>, window_params = [{transform_indices = @transform_0, window_bounds = array<i64: 16, 384>}, {pipeline_mode = #tpu.pipeline_mode<synchronous>, transform_indices = @transform_1, window_bounds = array<i64: 384, 128>}, {pipeline_mode = #tpu.pipeline_mode<synchronous>, transform_indices = @transform_2, window_bounds = array<i64: 1, 128>}, {pipeline_mode = #tpu.pipeline_mode<synchronous>, transform_indices = @transform_3, window_bounds = array<i64: 128, 384>}, {pipeline_mode = #tpu.pipeline_mode<synchronous>, transform_indices = @transform_4, window_bounds = array<i64: 1, 384>}, {transform_indices = @transform_5, window_bounds = array<i64: 16, 384>}]} {
    %c0 = arith.constant 0 : index
    %c0_0 = arith.constant 0 : index
    %0 = vector.load %arg1[%c0, %c0_0] : memref<16x384xf32, #tpu.memory_space<vmem>>, vector<16x384xf32>
    %c0_1 = arith.constant 0 : index
    %c0_2 = arith.constant 0 : index
    %1 = vector.load %arg2[%c0_1, %c0_2] : memref<384x128xf32, #tpu.memory_space<vmem>>, vector<384x128xf32>
    %cst = arith.constant dense<0.000000e+00> : vector<16x128xf32>
    %2 = tpu.matmul %0, %1, %cst {dimension_numbers = #tpu.dot_dimension_numbers<[1], [0], [0], [1], [0, 0, 1, 1], [], []>} : vector<16x384xf32>, vector<384x128xf32>, vector<16x128xf32> -> vector<16x128xf32>
    %c0_3 = arith.constant 0 : index
    %c0_4 = arith.constant 0 : index
    %3 = vector.load %arg3[%c0_3, %c0_4] : memref<1x128xf32, #tpu.memory_space<vmem>>, vector<1x128xf32>
    %4 = vector.broadcast %3 : vector<1x128xf32> to vector<16x128xf32>
    %5 = arith.addf %2, %4 : vector<16x128xf32>
    %cst_5 = arith.constant 0.000000e+00 : f32
    %6 = vector.broadcast %cst_5 : f32 to vector<16x128xf32>
    %7 = arith.maximumf %5, %6 : vector<16x128xf32>
    %c0_6 = arith.constant 0 : index
    %c0_7 = arith.constant 0 : index
    %8 = vector.load %arg4[%c0_6, %c0_7] : memref<128x384xf32, #tpu.memory_space<vmem>>, vector<128x384xf32>
    %cst_8 = arith.constant dense<0.000000e+00> : vector<16x384xf32>
    %9 = tpu.matmul %7, %8, %cst_8 {dimension_numbers = #tpu.dot_dimension_numbers<[1], [0], [0], [1], [0, 0, 1, 1], [], []>} : vector<16x128xf32>, vector<128x384xf32>, vector<16x384xf32> -> vector<16x384xf32>
    %c0_9 = arith.constant 0 : index
    %c0_10 = arith.constant 0 : index
    %10 = vector.load %arg5[%c0_9, %c0_10] : memref<1x384xf32, #tpu.memory_space<vmem>>, vector<1x384xf32>
    %11 = vector.broadcast %10 : vector<1x384xf32> to vector<16x384xf32>
    %12 = arith.addf %9, %11 : vector<16x384xf32>
    %c0_11 = arith.constant 0 : index
    %c0_12 = arith.constant 0 : index
    %13 = vector.load %arg6[%c0_11, %c0_12] : memref<16x384xf32, #tpu.memory_space<vmem>>, vector<16x384xf32>
    tpu.vector_store %arg6[%c0_11, %c0_12], %12 {strides = array<i32>} : memref<16x384xf32, #tpu.memory_space<vmem>>, vector<16x384xf32>,
    return
  }
  func.func @transform_0(%arg0: i32) -> (i32, i32) {
    %c0_i32 = arith.constant 0 : i32
    %c0_i32_0 = arith.constant 0 : i32
    return %arg0, %c0_i32 : i32, i32
  }
  func.func @transform_1(%arg0: i32) -> (i32, i32) {
    %c0_i32 = arith.constant 0 : i32
    %c0_i32_0 = arith.constant 0 : i32
    %c0_i32_1 = arith.constant 0 : i32
    return %c0_i32, %c0_i32_0 : i32, i32
  }
  func.func @transform_2(%arg0: i32) -> (i32, i32) {
    %c0_i32 = arith.constant 0 : i32
    %c0_i32_0 = arith.constant 0 : i32
    %c0_i32_1 = arith.constant 0 : i32
    return %c0_i32, %c0_i32_0 : i32, i32
  }
  func.func @transform_3(%arg0: i32) -> (i32, i32) {
    %c0_i32 = arith.constant 0 : i32
    %c0_i32_0 = arith.constant 0 : i32
    %c0_i32_1 = arith.constant 0 : i32
    return %c0_i32, %c0_i32_0 : i32, i32
  }
  func.func @transform_4(%arg0: i32) -> (i32, i32) {
    %c0_i32 = arith.constant 0 : i32
    %c0_i32_0 = arith.constant 0 : i32
    %c0_i32_1 = arith.constant 0 : i32
    return %c0_i32, %c0_i32_0 : i32, i32
  }
  func.func @transform_5(%arg0: i32) -> (i32, i32) {
    %c0_i32 = arith.constant 0 : i32
    %c0_i32_0 = arith.constant 0 : i32
    return %arg0, %c0_i32 : i32, i32
  }
}

</mosaic_0001>

<bundles_post_ra>
// kernel: transients_zipper_forward.1
= control target key start
LH: loop header
LB: loop body
LE: loop exit
PB: predicated region body
PF: predicated region fallthrough
CT: control target
= control target key end

     0   :  { %10 = vsyncpa [#allocation3], 0  ;;  %s921_s0 = inlined_call_operand.vmem [shape: f32[16,384], index: 0, kind: input, shape index: {}]   ;;  %s922_s1 = inlined_call_operand.hbm [shape: f32[384,128], index: 1, kind: input, shape index: {}]   ;;  %s923_s2 = inlined_call_operand.vmem [shape: f32[1,128], index: 2, kind: input, shape index: {}]   ;;  %s924_s3 = inlined_call_operand.hbm [shape: f32[128,384], index: 3, kind: input, shape index: {}]   ;;  %s925_s4 = inlined_call_operand.vmem [shape: f32[1,384], index: 4, kind: input, shape index: {}]   ;;  %s926_s5 = inlined_call_operand.vmem [shape: f32[16,384], index: 5, kind: output, shape index: {}]  }
   0x1   :  { %11 = vsyncpa [#allocation5], 0  ;;  %s818_s18 = smov [#allocation2]   ;;  %s770_s22 = scalar_lea.hbm %s922_s1, 6144 }
   0x2   :  { %s19_s19 = sshll.u32 %s818_s18, 4  ;;  %p771_p0 = scmp.ne.s32.totalorder %s922_s1, %s770_s22  ;;  %s20_s19 = int_to_ptr.vmem [resolvable:$true] %s19_s19 }
   0x3   :  { %p774_p1 = scmp.lt.u32.totalorder %s770_s22, %s922_s1 }
   0x5   :  { %p776_p2 = pnand %p774_p1, %p771_p0 }
   0x7   :  { %779 = shalt.err (!%p776_p2)
}
   0x8   :  { %s780_s27 = scalar_lea.vmem %s20_s19, 6144  ;;  %p785_p4 = scmp.lt.s32.totalorder %s20_s19, %s20_s19 }
   0x9   :  { %p781_p3 = scmp.ne.s32.totalorder %s20_s19, %s780_s27  ;;  %p786_p5 = scmp.lt.s32.totalorder %s780_s27, %s780_s27 }
   0xb   :  { %p787_p6 = por %p786_p5, %p785_p4 }
   0xd   :  { %p788_p7 = pnand %p787_p6, %p781_p3 }
   0xf   :  { %791 = shalt.err (!%p788_p7)
}
  0x10   :  { %s819_s28 = smov 128   ;;  %s820_s29 = smov 8  }
  0x11   :  { %25 = dma.hbm_to_vmem [thread:$0]  %s922_s1, 6144, %s20_s19, [#allocation3], %s819_s28, %s819_s28, %s820_s29  }
  0x12   :  { %s821_s7 = smov [#allocation4]   ;;  %s792_s11 = scalar_lea.hbm %s924_s3, 6144 }
  0x13   :  { %s33_s8 = sshll.u32 %s821_s7, 4  ;;  %p793_p8 = scmp.ne.s32.totalorder %s924_s3, %s792_s11  ;;  %s34_s8 = int_to_ptr.vmem [resolvable:$true] %s33_s8 }
  0x14   :  { %p796_p9 = scmp.lt.u32.totalorder %s792_s11, %s924_s3 }
  0x16   :  { %p798_p10 = pnand %p796_p9, %p793_p8 }
  0x18   :  { %801 = shalt.err (!%p798_p10)
}
  0x19   :  { %s802_s16 = scalar_lea.vmem %s34_s8, 6144  ;;  %p807_p12 = scmp.lt.s32.totalorder %s34_s8, %s34_s8 }
  0x1a   :  { %p803_p11 = scmp.ne.s32.totalorder %s34_s8, %s802_s16  ;;  %p808_p13 = scmp.lt.s32.totalorder %s802_s16, %s802_s16 }
  0x1c   :  { %p809_p0 = por %p808_p13, %p807_p12 }
  0x1e   :  { %p810_p1 = pnand %p809_p0, %p803_p11 }
  0x20   :  { %813 = shalt.err (!%p810_p1)
}
  0x21   :  { %s822_s1 = smov 384   ;;  %s823_s17 = smov 24  }
  0x22   :  { %39 = dma.hbm_to_vmem [thread:$0]  %s924_s3, 6144, %s34_s8, [#allocation5], %s822_s1, %s822_s1, %s823_s17  }
  0x23   :  { %814 = dma.done.wait [#allocation3], 6144  }
  0x24   :  { %815 = vsyncadd [#allocation3], 4294961152 }
  0x25   :  { %816 = dma.done.wait [#allocation5], 6144  }
  0x26   :  { %817 = vsyncadd [#allocation5], 4294961152  ;;  %v70_v0 = vld [vmem:[#allocation2 + $0x80] sm:$0xff]  ;;  %v71_v1 = vld [vmem:[#allocation2 + $0x88] sm:$0xff] }
  0x27   :  { %v54_v2 = vld [vmem:[#allocation2] sm:$0xff]  ;;  %v635_v3 = vpack.c.bf16 %v71_v1, %v70_v0  ;;  %v55_v4 = vld [vmem:[#allocation2 + $0x8] sm:$0xff]  ;;  %v72_v9 = vld [vmem:[#allocation2 + $0x90] sm:$0xff] }
  0x28   :  { %v86_v5 = vld [vmem:[#allocation2 + $0x100] sm:$0xff]  ;;  %v87_v6 = vld [vmem:[#allocation2 + $0x108] sm:$0xff]  ;;  %v637_v7 = vpack.c.bf16 %v55_v4, %v54_v2  ;;  %v73_v10 = vld [vmem:[#allocation2 + $0x98] sm:$0xff] }
  0x29   :  { %v667_v8 = vpack.c.bf16 %v87_v6, %v86_v5  ;;  %v56_v11 = vld [vmem:[#allocation2 + $0x10] sm:$0xff]  ;;  %636 = vmatprep.subr.bf16.mxu0 %v635_v3  ;;  %v639_v12 = vpack.c.bf16 %v73_v10, %v72_v9  ;;  %v57_v13 = vld [vmem:[#allocation2 + $0x18] sm:$0xff]  ;;  %v74_v18 = vld [vmem:[#allocation2 + $0xa0] sm:$0xff] }
  0x2a   :  { %v88_v14 = vld [vmem:[#allocation2 + $0x110] sm:$0xff]  ;;  %v89_v15 = vld [vmem:[#allocation2 + $0x118] sm:$0xff]  ;;  %638 = vmatpush3.bf16.msra.mxu0 %v637_v7  ;;  %v641_v16 = vpack.c.bf16 %v57_v13, %v56_v11  ;;  %v75_v19 = vld [vmem:[#allocation2 + $0xa8] sm:$0xff] }
  0x2b   :  { %668 = vmatprep.subr.bf16.mxu1 %v667_v8  ;;  %v671_v17 = vpack.c.bf16 %v89_v15, %v88_v14  ;;  %v58_v20 = vld [vmem:[#allocation2 + $0x20] sm:$0xff]  ;;  %640 = vmatprep.subr.bf16.mxu0 %v639_v12  ;;  %v643_v21 = vpack.c.bf16 %v75_v19, %v74_v18  ;;  %v59_v22 = vld [vmem:[#allocation2 + $0x28] sm:$0xff]  ;;  %v76_v26 = vld [vmem:[#allocation2 + $0xb0] sm:$0xff] }
  0x2c   :  { %670 = vmatpush3.bf16.msra.mxu1 %v667_v8  ;;  %v90_v23 = vld [vmem:[#allocation2 + $0x120] sm:$0xff]  ;;  %v91_v24 = vld [vmem:[#allocation2 + $0x128] sm:$0xff]  ;;  %v77_v27 = vld [vmem:[#allocation2 + $0xb8] sm:$0xff]  ;;  %v645_v30 = vpack.c.bf16 %v59_v22, %v58_v20 }
  0x2d   :  { %672 = vmatprep.subr.bf16.mxu1 %v671_v17  ;;  %v675_v25 = vpack.c.bf16 %v91_v24, %v90_v23  ;;  %v92_v28 = vld [vmem:[#allocation2 + $0x130] sm:$0xff]  ;;  %v93_v29 = vld [vmem:[#allocation2 + $0x138] sm:$0xff]  ;;  %v647_v31 = vpack.c.bf16 %v77_v27, %v76_v26  ;;  %v78_v35 = vld [vmem:[#allocation2 + $0xc0] sm:$0xff] }
  0x2e   :  { %642 = vmatpush3.bf16.msra.mxu0 %v641_v16  ;;  %v60_v32 = vld [vmem:[#allocation2 + $0x30] sm:$0xff]  ;;  %v61_v33 = vld [vmem:[#allocation2 + $0x38] sm:$0xff]  ;;  %v679_v34 = vpack.c.bf16 %v93_v29, %v92_v28  ;;  %v79_v36 = vld [vmem:[#allocation2 + $0xc8] sm:$0xff] }
  0x2f   :  { %644 = vmatprep.subr.bf16.mxu0 %v643_v21  ;;  %v94_v37 = vld [vmem:[#allocation2 + $0x140] sm:$0xff]  ;;  %v95_v38 = vld [vmem:[#allocation2 + $0x148] sm:$0xff]  ;;  %v649_v39 = vpack.c.bf16 %v61_v33, %v60_v32  ;;  %v651_v40 = vpack.c.bf16 %v79_v36, %v78_v35  ;;  %v80_v44 = vld [vmem:[#allocation2 + $0xd0] sm:$0xff] }
  0x30   :  { %674 = vmatpush3.bf16.msra.mxu1 %v671_v17  ;;  %v62_v41 = vld [vmem:[#allocation2 + $0x40] sm:$0xff]  ;;  %v63_v42 = vld [vmem:[#allocation2 + $0x48] sm:$0xff]  ;;  %v683_v43 = vpack.c.bf16 %v95_v38, %v94_v37  ;;  %v81_v45 = vld [vmem:[#allocation2 + $0xd8] sm:$0xff] }
  0x31   :  { %676 = vmatprep.subr.bf16.mxu1 %v675_v25  ;;  %v96_v46 = vld [vmem:[#allocation2 + $0x150] sm:$0xff]  ;;  %v97_v47 = vld [vmem:[#allocation2 + $0x158] sm:$0xff]  ;;  %v49_v48 = vld [vmem:[%s921_s0 + $0x8] sm:$0xff]  ;;  %v653_v49 = vpack.c.bf16 %v63_v42, %v62_v41  ;;  %v655_v51 = vpack.c.bf16 %v81_v45, %v80_v44 }
  0x32   :  { %646 = vmatpush3.bf16.msra.mxu0 %v645_v30  ;;  %173 = vmatprep.mubr.f32.mxu0 %v49_v48  ;;  %v50_v50 = vld [vmem:[%s921_s0 + $0x10] sm:$0xff]  ;;  %v65_v53 = vld [vmem:[#allocation2 + $0x58] sm:$0xff]  ;;  %v687_v54 = vpack.c.bf16 %v97_v47, %v96_v46  ;;  %v82_v55 = vld [vmem:[#allocation2 + $0xe0] sm:$0xff] }
  0x33   :  { %648 = vmatprep.subr.bf16.mxu0 %v647_v31  ;;  %v64_v52 = vld [vmem:[#allocation2 + $0x50] sm:$0xff]  ;;  %v83_v56 = vld [vmem:[#allocation2 + $0xe8] sm:$0xff]  ;;  %597 = vmatprep.mubr.f32.mxu1 %v50_v50  ;;  %v98_v57 = vld [vmem:[#allocation2 + $0x160] sm:$0xff] }
  0x34   :  { %678 = vmatpush3.bf16.msra.mxu1 %v675_v25  ;;  %v99_v58 = vld [vmem:[#allocation2 + $0x168] sm:$0xff]  ;;  %v657_v59 = vpack.c.bf16 %v65_v53, %v64_v52  ;;  %v659_v60 = vpack.c.bf16 %v83_v56, %v82_v55  ;;  %v66_v61 = vld [vmem:[#allocation2 + $0x60] sm:$0xff]  ;;  %v84_v0 = vld [vmem:[#allocation2 + $0xf0] sm:$0xff] }
  0x35   :  { %680 = vmatprep.subr.bf16.mxu1 %v679_v34  ;;  %v67_v62 = vld [vmem:[#allocation2 + $0x68] sm:$0xff]  ;;  %v691_v63 = vpack.c.bf16 %v99_v58, %v98_v57  ;;  %v85_v1 = vld [vmem:[#allocation2 + $0xf8] sm:$0xff]  ;;  %v100_v2 = vld [vmem:[#allocation2 + $0x170] sm:$0xff] }
  0x36   :  { %650 = vmatpush3.bf16.msra.mxu0 %v649_v39  ;;  %v101_v3 = vld [vmem:[#allocation2 + $0x178] sm:$0xff]  ;;  %v661_v4 = vpack.c.bf16 %v67_v62, %v66_v61  ;;  %v663_v5 = vpack.c.bf16 %v85_v1, %v84_v0  ;;  %v68_v6 = vld [vmem:[#allocation2 + $0x70] sm:$0xff]  ;;  %v262_v9 = vld [vmem:[#allocation4 + $0x8] sm:$0xff] }
  0x37   :  { %652 = vmatprep.subr.bf16.mxu0 %v651_v40  ;;  %v69_v7 = vld [vmem:[#allocation2 + $0x78] sm:$0xff]  ;;  %v695_v8 = vpack.c.bf16 %v101_v3, %v100_v2  ;;  %v265_v10 = vld [vmem:[#allocation4 + $0x20] sm:$0xff]  ;;  %v263_v11 = vld [vmem:[#allocation4 + $0x10] sm:$0xff] }
  0x38   :  { %682 = vmatpush3.bf16.msra.mxu1 %v679_v34  ;;  %v266_v12 = vld [vmem:[#allocation4 + $0x28] sm:$0xff]  ;;  %v665_v13 = vpack.c.bf16 %v69_v7, %v68_v6  ;;  %v699_v14 = vpack.c.bf16 %v265_v10, %v262_v9  ;;  %v261_v15 = vld [vmem:[#allocation4] sm:$0xff]  ;;  %v264_v16 = vld [vmem:[#allocation4 + $0x18] sm:$0xff] }
  0x39   :  { %684 = vmatprep.subr.bf16.mxu1 %v683_v43  ;;  %v268_v17 = vld [vmem:[#allocation4 + $0x38] sm:$0xff]  ;;  %v731_v18 = vpack.c.bf16 %v266_v12, %v263_v11  ;;  %v271_v19 = vld [vmem:[#allocation4 + $0x50] sm:$0xff]  ;;  %v269_v20 = vld [vmem:[#allocation4 + $0x40] sm:$0xff]  ;;  %v701_v25 = vpack.c.bf16 %v264_v16, %v261_v15 }
  0x3a   :  { %654 = vmatpush3.bf16.msra.mxu0 %v653_v49  ;;  %v272_v21 = vld [vmem:[#allocation4 + $0x58] sm:$0xff]  ;;  %v48_v22 = vld [vmem:[%s921_s0] sm:$0xff]  ;;  %v53_v24 = vld [vmem:[%s921_s0 + $0x28] sm:$0xff]  ;;  %v703_v26 = vpack.c.bf16 %v271_v19, %v268_v17 }
  0x3b   :  { %656 = vmatprep.subr.bf16.mxu0 %v655_v51  ;;  %v52_v23 = vld [vmem:[%s921_s0 + $0x20] sm:$0xff]  ;;  %v267_v27 = vld [vmem:[#allocation4 + $0x30] sm:$0xff]  ;;  %v270_v28 = vld [vmem:[#allocation4 + $0x48] sm:$0xff]  ;;  %v735_v30 = vpack.c.bf16 %v272_v21, %v269_v20 }
  0x3c   :  { %686 = vmatpush3.bf16.msra.mxu1 %v683_v43  ;;  %v274_v29 = vld [vmem:[#allocation4 + $0x68] sm:$0xff]  ;;  %v277_v31 = vld [vmem:[#allocation4 + $0x80] sm:$0xff]  ;;  %v275_v32 = vld [vmem:[#allocation4 + $0x70] sm:$0xff]  ;;  %v705_v35 = vpack.c.bf16 %v270_v28, %v267_v27 }
  0x3d   :  { %688 = vmatprep.subr.bf16.mxu1 %v687_v54  ;;  %v278_v33 = vld [vmem:[#allocation4 + $0x88] sm:$0xff]  ;;  %v51_v34 = vld [vmem:[%s921_s0 + $0x18] sm:$0xff]  ;;  %v707_v36 = vpack.c.bf16 %v277_v31, %v274_v29  ;;  %v273_v37 = vld [vmem:[#allocation4 + $0x60] sm:$0xff] }
  0x3e   :  { %658 = vmatpush3.bf16.msra.mxu0 %v657_v59  ;;  %v276_v38 = vld [vmem:[#allocation4 + $0x78] sm:$0xff]  ;;  %v739_v40 = vpack.c.bf16 %v278_v33, %v275_v32  ;;  %v283_v41 = vld [vmem:[#allocation4 + $0xb0] sm:$0xff]  ;;  %v281_v42 = vld [vmem:[#allocation4 + $0xa0] sm:$0xff] }
  0x3f   :  { %660 = vmatprep.subr.bf16.mxu0 %v659_v60  ;;  %v280_v39 = vld [vmem:[#allocation4 + $0x98] sm:$0xff]  ;;  %v709_v44 = vpack.c.bf16 %v276_v38, %v273_v37  ;;  %v279_v46 = vld [vmem:[#allocation4 + $0x90] sm:$0xff]  ;;  %v282_v47 = vld [vmem:[#allocation4 + $0xa8] sm:$0xff]  ;;  %v311_v38 = vlaneseq }
  0x40   :  { %690 = vmatpush3.bf16.msra.mxu1 %v687_v54  ;;  %v284_v43 = vld [vmem:[#allocation4 + $0xb8] sm:$0xff]  ;;  %v711_v45 = vpack.c.bf16 %v283_v41, %v280_v39  ;;  %v286_v48 = vld [vmem:[#allocation4 + $0xc8] sm:$0xff]  ;;  %v289_v50 = vld [vmem:[#allocation4 + $0xe0] sm:$0xff]  ;;  %v713_v53 = vpack.c.bf16 %v282_v47, %v279_v46 }
  0x41   :  { %692 = vmatprep.subr.bf16.mxu1 %v691_v63  ;;  %v743_v49 = vpack.c.bf16 %v284_v43, %v281_v42  ;;  %v287_v51 = vld [vmem:[#allocation4 + $0xd0] sm:$0xff]  ;;  %v290_v52 = vld [vmem:[#allocation4 + $0xe8] sm:$0xff]  ;;  %v715_v54 = vpack.c.bf16 %v289_v50, %v286_v48  ;;  %v285_v55 = vld [vmem:[#allocation4 + $0xc0] sm:$0xff]  ;;  %v312_v39 = vshrl.u32 %v311_v38, 7 }
  0x42   :  { %662 = vmatpush3.bf16.msra.mxu0 %v661_v4  ;;  %v288_v56 = vld [vmem:[#allocation4 + $0xd8] sm:$0xff]  ;;  %v747_v57 = vpack.c.bf16 %v290_v52, %v287_v51  ;;  %v295_v59 = vld [vmem:[#allocation4 + $0x110] sm:$0xff]  ;;  %v298_v1 = vld [vmem:[#allocation4 + $0x128] sm:$0xff] }
  0x43   :  { %664 = vmatprep.subr.bf16.mxu0 %v663_v5  ;;  %v292_v58 = vld [vmem:[#allocation4 + $0xf8] sm:$0xff]  ;;  %v717_v60 = vpack.c.bf16 %v288_v56, %v285_v55  ;;  %v291_v62 = vld [vmem:[#allocation4 + $0xf0] sm:$0xff]  ;;  %v301_v2 = vld [vmem:[#allocation4 + $0x140] sm:$0xff]  ;;  %v317_v42 = vsub.s32 1, %v312_v39 }
  0x44   :  { %694 = vmatpush3.bf16.msra.mxu1 %v691_v63  ;;  %v719_v61 = vpack.c.bf16 %v295_v59, %v292_v58  ;;  %v294_v63 = vld [vmem:[#allocation4 + $0x108] sm:$0xff]  ;;  %v293_v3 = vld [vmem:[#allocation4 + $0x100] sm:$0xff]  ;;  %v723_v4 = vpack.c.bf16 %v301_v2, %v298_v1  ;;  %v296_v5 = vld [vmem:[#allocation4 + $0x118] sm:$0xff] }
  0x45   :  { %696 = vmatprep.subr.bf16.mxu1 %v695_v8  ;;  %v721_v0 = vpack.c.bf16 %v294_v63, %v291_v62  ;;  %v297_v6 = vld [vmem:[#allocation4 + $0x120] sm:$0xff]  ;;  %v300_v7 = vld [vmem:[#allocation4 + $0x138] sm:$0xff]  ;;  %v307_v11 = vld [vmem:[#allocation4 + $0x170] sm:$0xff] }
  0x46   :  { %666 = vmatpush3.bf16.msra.mxu0 %v665_v13  ;;  %v725_v9 = vpack.c.bf16 %v300_v7, %v297_v6  ;;  %v304_v10 = vld [vmem:[#allocation4 + $0x158] sm:$0xff]  ;;  %v299_v13 = vld [vmem:[#allocation4 + $0x130] sm:$0xff]  ;;  %v306_v17 = vld [vmem:[#allocation4 + $0x168] sm:$0xff] }
  0x47   :  { %700 = vmatprep.subr.bf16.mxu0 %v699_v14  ;;  %v727_v12 = vpack.c.bf16 %v307_v11, %v304_v10  ;;  %v302_v14 = vld [vmem:[#allocation4 + $0x148] sm:$0xff]  ;;  %v303_v15 = vld [vmem:[#allocation4 + $0x150] sm:$0xff]  ;;  %v305_v19 = vld [vmem:[#allocation4 + $0x160] sm:$0xff] }
  0x48   :  { %698 = vmatpush3.bf16.msra.mxu1 %v695_v8  ;;  %v751_v8 = vpack.c.bf16 %v296_v5, %v293_v3  ;;  %v755_v16 = vpack.c.bf16 %v302_v14, %v299_v13  ;;  %v308_v20 = vld [vmem:[#allocation4 + $0x178] sm:$0xff]  ;;  %v309_v41 = vld [vmem:[%s925_s4] sm:$0x7] }
  0x49   :  { %732 = vmatprep.subr.bf16.mxu1 %v731_v18  ;;  %174 = vmatmul.mubr.f32.vlgmr.msra.gmra.mrb[0].mxu0 %v48_v22  ;;  %v759_v21 = vpack.c.bf16 %v308_v20, %v305_v19  ;;  %v824_v22 = vmov 0.0  }
  0x4a   :  { %178 = vmatprep.mubr.f32.mxu0 %v52_v23  ;;  %702 = vmatpush1.bf16.msra.mxu0 %v701_v25 }
  0x4b   :  { %598 = vmatmul.mubr.f32.vlgmr.msra.gmra.mrb[0].mxu1 %v53_v24  ;;  %704 = vmatprep.subr.bf16.mxu0 %v703_v26  ;;  %v490_v26 = vld [vmem:[%s923_s2] ss:$0 sm:$0xff] }
  0x4c   :  { %734 = vmatpush3.bf16.msra.mxu1 %v731_v18  ;;  %v729_v18 = vpack.c.bf16 %v306_v17, %v303_v15 }
  0x4d   :  { %736 = vmatprep.subr.bf16.mxu1 %v735_v30  ;;  %179 = vmatmul.mubr.f32.gmra.mrb[2].mxu0 %v51_v34 }
  0x4e   :  { %706 = vmatpush1.bf16.msra.mxu0 %v705_v35  ;;  %390 = vmatprep.mubr.f32.mxu0 %v824_v22 }
  0x4f   :  { %708 = vmatprep.subr.bf16.mxu0 %v707_v36 }
  0x50   :  { %738 = vmatpush3.bf16.msra.mxu1 %v735_v30 }
  0x51   :  { %740 = vmatprep.subr.bf16.mxu1 %v739_v40 }
  0x52   :  { %710 = vmatpush1.bf16.msra.mxu0 %v709_v44  ;;  %v321_v44 = vsub.s32 2, %v312_v39 }
  0x53   :  { %712 = vmatprep.subr.bf16.mxu0 %v711_v45  ;;  %v318_v45 = vrot.slane %v309_v41, %v317_v42 }
  0x54   :  { %742 = vmatpush3.bf16.msra.mxu1 %v739_v40  ;;  %v313_v40 = vsub.s32 0, %v312_v39 }
  0x55   :  { %744 = vmatprep.subr.bf16.mxu1 %v743_v49 }
  0x56   :  { %714 = vmatpush1.bf16.msra.mxu0 %v713_v53  ;;  %v314_v43 = vrot.slane %v309_v41, %v313_v40 }
  0x57   :  { %716 = vmatprep.subr.bf16.mxu0 %v715_v54 }
  0x58   :  { %746 = vmatpush3.bf16.msra.mxu1 %v743_v49  ;;  %v322_v49 = vrot.slane %v309_v41, %v321_v44 }
  0x59   :  { %748 = vmatprep.subr.bf16.mxu1 %v747_v57 }
  0x5a   :  { %718 = vmatpush1.bf16.msra.mxu0 %v717_v60 }
  0x5b   :  { %720 = vmatprep.subr.bf16.mxu0 %v719_v61 }
  0x5c   :  { %750 = vmatpush3.bf16.msra.mxu1 %v747_v57 }
  0x5d   :  { %752 = vmatprep.subr.bf16.mxu1 %v751_v8 }
  0x5e   :  { %722 = vmatpush1.bf16.msra.mxu0 %v721_v0 }
  0x5f   :  { %724 = vmatprep.subr.bf16.mxu0 %v723_v4 }
  0x60   :  { %754 = vmatpush3.bf16.msra.mxu1 %v751_v8 }
  0x61   :  { %756 = vmatprep.subr.bf16.mxu1 %v755_v16 }
  0x62   :  { %726 = vmatpush1.bf16.msra.mxu0 %v725_v9 }
  0x63   :  { %728 = vmatprep.subr.bf16.mxu0 %v727_v12 }
  0x64   :  { %758 = vmatpush3.bf16.msra.mxu1 %v755_v16 }
  0x65   :  { %760 = vmatprep.subr.bf16.mxu1 %v759_v21 }
  0x66   :  { %730 = vmatpush1.bf16.msra.mxu0 %v729_v18 }
  0x68   :  { %762 = vmatpush3.bf16.msra.mxu1 %v759_v21 }
 0x11c   :  { %v523_v23 = vpop.f32.mrb[0].mxu0 }
 0x11d   :  { %v524_v24 = vpop.f32.mrb[1].mxu0 }
 0x11e   :  { %v599_v25 = vpop.f32.mrb[0].mxu1  ;;  %v525_v27 = vadd.f32 %v524_v24, %v523_v23 }
 0x11f   :  { %v250_v28 = vpop.f32.mrb[1].mxu1 }
 0x120   :  { %v526_v29 = vpop.f32.mrb[2].mxu0  ;;  %v176_v30 = vadd.f32 %v525_v27, %v490_v26 }
 0x121   :  { %v527_v31 = vpop.f32.mrb[3].mxu0 }
 0x122   :  { %v251_v32 = vadd.f32 %v250_v28, %v176_v30  ;;  %v528_v33 = vadd.f32 %v527_v31, %v526_v29 }
 0x124   :  { %v259_v34 = vmax.f32 %v251_v32, 0.0  ;;  %v181_v35 = vadd.f32 %v528_v33, %v490_v26 }
 0x126   :  { %391 = vmatmul.mubr.f32.vlgmr.msra.gmra.mrb[4].mxu0 %v259_v34  ;;  %632 = vmatprep.mubr.f32.mxu1 %v259_v34  ;;  %v256_v36 = vadd.f32 %v599_v25, %v181_v35 }
 0x127   :  { %396 = vmatprep.mubr.f32.mxu0 %v824_v22 }
 0x128   :  { %v260_v37 = vmax.f32 %v256_v36, 0.0 }
 0x12a   :  { %397 = vmatmul.mubr.f32.gmra.mrb[6].mxu0 %v260_v37  ;;  %633 = vmatmul.mubr.f32.vlgmr.msra.gmra.mrb[2].mxu1 %v260_v37 }
 0x1f9   :  { %v392_v46 = vpop.f32.mrb[4].mxu0 }
 0x1fa   :  { %v393_v47 = vadd.f32 %v392_v46, %v314_v43  ;;  %v394_v48 = vpop.f32.mrb[5].mxu0 }
 0x1fb   :  { %v395_v50 = vadd.f32 %v394_v48, %v318_v45 }
 0x1fc   :  { %478 = vst [vmem:[%s926_s5] sm:$0xff] %v393_v47 }
 0x1fd   :  { %479 = vst [vmem:[%s926_s5 + $0x8] sm:$0xff] %v395_v50  ;;  %v398_v51 = vpop.f32.mrb[6].mxu0  ;;  %v634_v52 = vpop.f32.mrb[2].mxu1 }
 0x1fe   :  { %v399_v53 = vadd.f32 %v398_v51, %v314_v43  ;;  %v475_v54 = vadd.f32 %v634_v52, %v322_v49  ;;  %v400_v55 = vpop.f32.mrb[7].mxu0  ;;  %v469_v56 = vpop.f32.mrb[3].mxu1 }
 0x1ff   :  { %v401_v57 = vadd.f32 %v400_v55, %v318_v45  ;;  %v470_v58 = vadd.f32 %v469_v56, %v322_v49 }
 0x200   :  { %481 = vst [vmem:[%s926_s5 + $0x18] sm:$0xff] %v399_v53  ;;  %483 = vst [vmem:[%s926_s5 + $0x28] sm:$0xff] %v475_v54 }
 0x201   :  { %482 = vst [vmem:[%s926_s5 + $0x20] sm:$0xff] %v401_v57  ;;  %480 = vst [vmem:[%s926_s5 + $0x10] sm:$0xff] %v470_v58 }
 0x202   :  { %488 = vsyncpa [#allocation3], 1 }
 0x203   :  { %489 = vsyncpa [#allocation5], 1 }

</bundles_post_ra>
